<compile_context>
chip_gen: v7x
topology: tpu7x:2x2x1
jax: 0.10.0
libtpu: 0.0.40
codegen_flags: <defaults>
</compile_context>

<pallas_src>
import jax
import jax.numpy as jnp
from jax.experimental import pallas as pl
from jax.experimental.pallas import tpu as pltpu

EPS = 1e-12


def _round_up(v, m):
    return ((v + m - 1) // m) * m


def gated_encoder_forward(x, w_u, w_v, kernel_size=16, stride=8, *, tl=None,
                          compute_dtype=jnp.float32, eps=EPS):
    """x: (B, C, T) f32. w_u, w_v: (N, C, K) Conv1d weights (bias=False). Returns (B, N, L)."""
    B, C, T = x.shape
    N = w_u.shape[0]
    K = int(kernel_size)
    S = int(stride)
    L = (T - K) // S + 1
    assert L >= 1, "input too short for a single frame"

    # ---- L tiling: lane-dense output tiles (multiple of 128 when multi-tile) ----
    if tl is None:
        tl = 512
    tl = min(tl, _round_up(L, 128))
    if tl < L:
        tl = _round_up(tl, 128)
    num_lt = (L + tl - 1) // tl
    L_pad = num_lt * tl
    tneed_tile = (tl - 1) * S + K           # raw samples one L tile needs (incl. halo)
    t_need = (L_pad - 1) * S + K            # raw samples touched by the last (padded) tile

    # ---- T tiling for the norm reduction + shared zero padding ----
    tt_cap = 4096                            # multiple of 128
    base = max(T, t_need)
    if base <= tt_cap:
        tt, t_pad = base, base
    else:
        tt, t_pad = tt_cap, _round_up(base, tt_cap)
    num_tt = t_pad // tt
    x_pad = x if t_pad == T else jnp.pad(x, ((0, 0), (0, 0), (0, t_pad - T)))

    # ---- kernel 1: per-(b, c) reciprocal L2 norm over time, tiled + accumulated ----
    def _norm_kernel(x_ref, scale_ref, acc_ref):
        t = pl.program_id(1)

        @pl.when(t == 0)
        def _init():
            acc_ref[...] = jnp.zeros_like(acc_ref)

        xt = x_ref[...]                                        # (C, tt)
        acc_ref[...] += jnp.sum(xt * xt, axis=1, keepdims=True)

        @pl.when(t == pl.num_programs(1) - 1)
        def _fin():
            scale_ref[...] = 1.0 / (jnp.sqrt(acc_ref[...]) + eps)

    scale = pl.pallas_call(
        _norm_kernel,
        out_shape=jax.ShapeDtypeStruct((B, C, 1), jnp.float32),
        grid=(B, num_tt),
        in_specs=[pl.BlockSpec((None, C, tt), lambda b, t: (b, 0, t))],
        out_specs=pl.BlockSpec((None, C, 1), lambda b, t: (b, 0, 0)),
        scratch_shapes=[pltpu.VMEM((C, 1), jnp.float32)],
        compiler_params=pltpu.CompilerParams(
            dimension_semantics=("parallel", "arbitrary")),
    )(x_pad)

    # ---- fused U/V weights, reordered to the in-kernel frame layout (feature = k*C + c) ----
    w_cat = jnp.concatenate([w_u, w_v], axis=0).astype(jnp.float32)      # (2N, C, K)
    wuv = jnp.transpose(w_cat, (0, 2, 1)).reshape(2 * N, K * C)          # (2N, K*C)
    wuv = wuv.astype(compute_dtype)

    # ---- kernel 2: manual DMA of raw slab -> in-VMEM im2col -> fused matmul -> gate ----
    def _gated_kernel(scale_ref, wuv_ref, x_hbm, out_ref, xbuf, dma_sem):
        b = pl.program_id(0)
        lt = pl.program_id(1)
        t0 = pl.multiple_of(lt * (tl * S), tl * S)
        # 1x HBM read of the raw input slab (TL frames + halo); im2col never hits HBM.
        cp = pltpu.make_async_copy(x_hbm.at[b, :, pl.ds(t0, tneed_tile)], xbuf, dma_sem)
        cp.start()
        # TODO(synk): double-buffer this DMA (prefetch tile lt+1) to hide HBM latency.
        cp.wait()

        xbuf[...] = xbuf[...] * scale_ref[...]                 # x / (||x|| + eps), (C,1) bcast
        # In-VMEM im2col: K strided views of the slab; frame feature order is k*C + c,
        # which the reordered fused weight matrix matches.
        frames = jnp.concatenate(
            [xbuf[:, pl.ds(k, tl, stride=S)] for k in range(K)], axis=0)   # (K*C, TL)
        frames = frames.astype(compute_dtype)
        uv = jnp.dot(wuv_ref[...], frames,
                     preferred_element_type=jnp.float32)       # (2N, TL): one MXU pass
        out_ref[...] = (uv[:N, :] * uv[N:, :]).astype(out_ref.dtype)   # gate; lane-dense store

    out_pad = pl.pallas_call(
        _gated_kernel,
        out_shape=jax.ShapeDtypeStruct((B, N, L_pad), jnp.float32),
        grid=(B, num_lt),
        in_specs=[
            pl.BlockSpec((None, C, 1), lambda b, lt: (b, 0, 0)),   # 1/(norm+eps)
            pl.BlockSpec((2 * N, K * C), lambda b, lt: (0, 0)),    # fused, reordered weights
            pl.BlockSpec(memory_space=pl.ANY),                     # raw x in HBM, manual DMA
        ],
        out_specs=pl.BlockSpec((None, N, tl), lambda b, lt: (b, 0, lt)),
        scratch_shapes=[
            pltpu.VMEM((C, tneed_tile), jnp.float32),
            pltpu.SemaphoreType.DMA(()),
        ],
        compiler_params=pltpu.CompilerParams(
            dimension_semantics=("parallel", "parallel")),
    )(scale, wuv, x_pad)

    return out_pad if L_pad == L else out_pad[:, :, :L]         # already (B, N, L): no transpose


def _reference(x, w_u, w_v, kernel_size, stride, eps=EPS):
    """Pure-JAX reference mirroring the PyTorch forward."""
    norm = jnp.sqrt(jnp.sum(x * x, axis=2, keepdims=True))
    xs = x / (norm + eps)
    dn = jax.lax.conv_dimension_numbers(xs.shape, w_u.shape, ("NCH", "OIH", "NCH"))
    xu = jax.lax.conv_general_dilated(xs, w_u, (stride,), "VALID", dimension_numbers=dn,
                                      precision=jax.lax.Precision.HIGHEST)
    xv = jax.lax.conv_general_dilated(xs, w_v, (stride,), "VALID", dimension_numbers=dn,
                                      precision=jax.lax.Precision.HIGHEST)
    return xu * xv


if __name__ == "__main__":
    B, C_in, n_basis, Ksz, stride = 2, 4, 32, 16, 8
    T = 2056                               # -> L = 256 frames = two lane-dense 128-wide L tiles

    key = jax.random.PRNGKey(0)
    kx, ku, kv = jax.random.split(key, 3)
    x = jax.random.normal(kx, (B, C_in, T), dtype=jnp.float32)
    # deterministic synthetic Conv1d weights, shape (n_basis, in_channels, kernel_size)
    fan_in = float(C_in * Ksz)
    w_u = jax.random.normal(ku, (n_basis, C_in, Ksz), dtype=jnp.float32) / jnp.sqrt(fan_in)
    w_v = jax.random.normal(kv, (n_basis, C_in, Ksz), dtype=jnp.float32) / jnp.sqrt(fan_in)

    out = gated_encoder_forward(x, w_u, w_v, Ksz, stride, tl=128)
    out = jax.block_until_ready(out)

    ref = _reference(x, w_u, w_v, Ksz, stride)
    L = (T - Ksz) // stride + 1
    assert out.shape == (B, n_basis, L), out.shape
    max_err = float(jnp.max(jnp.abs(out - ref)))
    assert jnp.allclose(out, ref, atol=1e-5, rtol=1e-5), max_err
    print("KERNEL_OK")
</pallas_src>

<mosaic_0001>
module attributes {stable_mosaic.version = 11 : i64} {
  func.func @_norm_kernel(%arg0: i32, %arg1: i32, %arg2: memref<1x4x2056xf32, #tpu.memory_space<vmem>>, %arg3: memref<1x4x1xf32, #tpu.memory_space<vmem>>, %arg4: memref<4x1xf32, #tpu.memory_space<vmem>>) attributes {dimension_semantics = [#tpu.dimension_semantics<parallel>, #tpu.dimension_semantics<arbitrary>], iteration_bounds = array<i64: 2, 1>, scalar_prefetch = 0 : i64, scratch_operands = 1 : i64, tpu.core_type = #tpu.core_type<tc>, window_params = [{transform_indices = @transform_0, window_bounds = array<i64: 1, 4, 2056>}, {transform_indices = @transform_1, window_bounds = array<i64: 1, 4, 1>}]} {
    %c0_i32 = arith.constant 0 : i32
    %0 = arith.cmpi eq, %arg1, %c0_i32 : i32
    %1 = arith.extui %0 : i1 to i32
    %c0_i32_0 = arith.constant 0 : i32
    %2 = arith.cmpi ne, %1, %c0_i32_0 : i32
    scf.if %2 {
      %cst_9 = arith.constant 0.000000e+00 : f32
      %14 = vector.broadcast %cst_9 : f32 to vector<4x1xf32>
      %c0_10 = arith.constant 0 : index
      %c0_11 = arith.constant 0 : index
      %15 = vector.load %arg4[%c0_10, %c0_11] : memref<4x1xf32, #tpu.memory_space<vmem>>, vector<4x1xf32>
      tpu.vector_store %arg4[%c0_10, %c0_11], %14 {strides = array<i32>} : memref<4x1xf32, #tpu.memory_space<vmem>>, vector<4x1xf32>,
    } else {
    }
    %c0 = arith.constant 0 : index
    %c0_1 = arith.constant 0 : index
    %c0_2 = arith.constant 0 : index
    %3 = vector.load %arg2[%c0, %c0_1, %c0_2] : memref<1x4x2056xf32, #tpu.memory_space<vmem>>, vector<1x4x2056xf32>
    %4 = vector.shape_cast %3 : vector<1x4x2056xf32> to vector<4x2056xf32>
    %c0_3 = arith.constant 0 : index
    %c0_4 = arith.constant 0 : index
    %5 = vector.load %arg4[%c0_3, %c0_4] : memref<4x1xf32, #tpu.memory_space<vmem>>, vector<4x1xf32>
    %6 = arith.mulf %4, %4 : vector<4x2056xf32>
    %cst = arith.constant dense<0.000000e+00> : vector<4xf32>
    %7 = vector.multi_reduction <add>, %6, %cst [1] : vector<4x2056xf32> to vector<4xf32>
    %8 = vector.shape_cast %7 : vector<4xf32> to vector<4x1xf32>
    %9 = arith.addf %5, %8 : vector<4x1xf32>
    %c0_5 = arith.constant 0 : index
    %c0_6 = arith.constant 0 : index
    %10 = vector.load %arg4[%c0_5, %c0_6] : memref<4x1xf32, #tpu.memory_space<vmem>>, vector<4x1xf32>
    tpu.vector_store %arg4[%c0_5, %c0_6], %9 {strides = array<i32>} : memref<4x1xf32, #tpu.memory_space<vmem>>, vector<4x1xf32>,
    %c0_i32_7 = arith.constant 0 : i32
    %11 = arith.cmpi eq, %arg1, %c0_i32_7 : i32
    %12 = arith.extui %11 : i1 to i32
    %c0_i32_8 = arith.constant 0 : i32
    %13 = arith.cmpi ne, %12, %c0_i32_8 : i32
    scf.if %13 {
      %c0_9 = arith.constant 0 : index
      %c0_10 = arith.constant 0 : index
      %14 = vector.load %arg4[%c0_9, %c0_10] : memref<4x1xf32, #tpu.memory_space<vmem>>, vector<4x1xf32>
      %15 = math.sqrt %14 : vector<4x1xf32>
      %cst_11 = arith.constant 9.99999996E-13 : f32
      %16 = vector.broadcast %cst_11 : f32 to vector<4x1xf32>
      %17 = arith.addf %15, %16 : vector<4x1xf32>
      %cst_12 = arith.constant 1.000000e+00 : f32
      %18 = vector.broadcast %cst_12 : f32 to vector<4x1xf32>
      %19 = arith.divf %18, %17 : vector<4x1xf32>
      %c0_13 = arith.constant 0 : index
      %c0_14 = arith.constant 0 : index
      %c0_15 = arith.constant 0 : index
      %20 = vector.load %arg3[%c0_13, %c0_14, %c0_15] : memref<1x4x1xf32, #tpu.memory_space<vmem>>, vector<1x4x1xf32>
      %21 = vector.shape_cast %20 : vector<1x4x1xf32> to vector<4x1xf32>
      %22 = vector.shape_cast %19 : vector<4x1xf32> to vector<1x4x1xf32>
      tpu.vector_store %arg3[%c0_13, %c0_14, %c0_15], %22 {strides = array<i32>} : memref<1x4x1xf32, #tpu.memory_space<vmem>>, vector<1x4x1xf32>,
    } else {
    }
    return
  }
  func.func @transform_0(%arg0: i32, %arg1: i32) -> (i32, i32, i32) {
    %c0_i32 = arith.constant 0 : i32
    %c0_i32_0 = arith.constant 0 : i32
    return %arg0, %c0_i32, %arg1 : i32, i32, i32
  }
  func.func @transform_1(%arg0: i32, %arg1: i32) -> (i32, i32, i32) {
    %c0_i32 = arith.constant 0 : i32
    %c0_i32_0 = arith.constant 0 : i32
    %c0_i32_1 = arith.constant 0 : i32
    return %arg0, %c0_i32, %c0_i32_0 : i32, i32, i32
  }
}

</mosaic_0001>

<bundles_post_ra>
// kernel: tpu_custom_call.1
= control target key start
LH: loop header
LB: loop body
LE: loop exit
PB: predicated region body
PF: predicated region fallthrough
CT: control target
= control target key end

     0   :  { %6 = vsyncpa [#allocation4], 0  ;;  %s645_s0 = inlined_call_operand.hbm [shape: f32[2,4,2056], index: 0, kind: input, shape index: {}]   ;;  %s646_s1 = inlined_call_operand.vmem [shape: f32[2,4,1], index: 1, kind: output, shape index: {}]  }
   0x1   :  { %8 = vsyncpa [#allocation4 + $0x1], 0  ;;  %s496_s6 = smov 0   ;;  %s498_s7 = smov 0  }
   0x2   :  { %s500_s8 = smov 0   ;;  %s502_s9 = smov 0  }
   0x3   :  { %s504_s10 = smov 0   ;;  %s506_s11 = smov 0  }
   0x4 LB: > { %s330_s12 = sadd.s32 4294967295, %s482_s11   ;;  %s26_s13 = sadd.s32 1, %s478_s10  ;;  %s482_s11 = sphi %s506_s11, %s14_s11   ;;  %s478_s10 = sphi %s504_s10, %s655_s10   ;;  %s474_s9 = sphi %s502_s9, %s654_s9   ;;  %s470_s8 = sphi %s500_s8, %s653_s8   ;;  %s466_s7 = sphi %s498_s7, %s652_s7   ;;  %s462_s6 = sphi %s496_s6, %s651_s6  }
   0x5   : > { %p28_p0 = scmp.ge.s32.totalorder %s26_s13, 2  ;;  %s35_s14 = sadd.s32 1, %s470_s8 }
   0x6   : > { %p42_p1 = scmp.ne.s32.totalorder %s470_s8, %s466_s7  ;;  %p43_p2 = scmp.eq.s32.totalorder %s482_s11, 0 }
   0x7   : > { %s657_s13 = smov (%p28_p0, %s26_s13), 0  ;;  %p48_p4 = scmp.ne.s32.totalorder %s466_s7, %s462_s6 }
   0x8   : > { %p44_p3 = por %p43_p2, %p42_p1  ;;  %s30_s15 = ssub.s32 %s478_s10, %s657_s13 }
   0x9   : > { %p49_p5 = scmp.eq.s32.totalorder %s330_s12, 0  ;;  %p33_p6 = scmp.eq.s32.totalorder %s30_s15, 0 }
   0xa   : > { %p348_p8 = scmp.lt.s32.totalorder %s482_s11, 2  ;;  %s98_s18 = sand.u32 1, %s470_s8  }
   0xb   : > { %p535_p7 = por %p49_p5, %p48_p4  ;;  %s340_s19 = smul.u32 1088, %s478_s10 }
   0xc   : > { %s541_s17 = scalar_select %p33_p6, %s470_s8, %s35_s14  }
   0xd   : > { %s339_s20 = smul.u32 68, %s98_s18  ;;  %s548_s23 = scalar_lea.hbm %s645_s0, %s340_s19 }
   0xe   : > { %p550_p9 = pnand %p348_p8, %p44_p3  ;;  %s99_s27 = scalar_lea.sflag [#allocation4], %s98_s18 }
   0xf   : > { %s102_s25 = scalar_lea.vmem [#allocation3], %s339_s20  ;;  %s402_s28 = scalar_lea.hbm %s548_s23, 1088 }
  0x10   : > { %s112_s26 = sshll.u32 %s102_s25, 4  ;;  %p403_p12 = scmp.ne.s32.totalorder %s548_s23, %s402_s28  ;;  %s555_s26 = int_to_ptr.vmem [resolvable:$true] %s112_s26 }
  0x11   : > { %p404_p13 = pneg %p550_p9  ;;  %s407_s2 = scalar_lea.hbm %s645_s0, 2176 }
  0x12   : > { %p408_p2 = scmp.lt.u32.totalorder %s548_s23, %s645_s0  ;;  %p409_p3 = scmp.lt.u32.totalorder %s407_s2, %s402_s28 }
  0x13   : > { %p405_p0 = pnand %p404_p13, %p403_p12  ;;  %p411_p5 = scmp.lt.u32.totalorder %s402_s28, %s548_s23 }
  0x14   : > { %p410_p4 = por %p409_p3, %p408_p2 }
  0x15   : > { %p406_p1 = pneg %p405_p0 }
  0x16   : > { %p412_p6 = por %p411_p5, %p410_p4 }
  0x18   : > { %p413_p8 = pnand %p412_p6, %p406_p1 }
  0x1a   : > { %416 = shalt.err (!%p413_p8)
}
  0x1b   : > { %s417_s5 = scalar_lea.vmem %s555_s26, 1088  ;;  %s484_s6 = smov [#allocation3]  }
  0x1c   : > { %p418_p12 = scmp.ne.s32.totalorder %s555_s26, %s417_s5  ;;  %s422_s12 = sshll.u32 %s484_s6, 4  ;;  %s423_s12 = int_to_ptr.vmem [resolvable:$false] %s422_s12 }
  0x1d   : > { %s424_s14 = scalar_lea.vmem %s423_s12, 2176  ;;  %p425_p11 = scmp.lt.s32.totalorder %s555_s26, %s423_s12 }
  0x1e   : > { %p420_p0 = pnand %p418_p12, %p404_p13  ;;  %p426_p2 = scmp.lt.s32.totalorder %s424_s14, %s417_s5 }
  0x20   : > { %p421_p10 = pneg %p420_p0  ;;  %p427_p3 = por %p426_p2, %p425_p11 }
  0x22   : > { %p428_p4 = pnand %p427_p3, %p421_p10 }
  0x24   : > { %431 = shalt.err (!%p428_p4)
}
  0x25   : > { %347 = dma.hbm_to_vmem [thread:$0]  (!%p550_p9), %s548_s23, 1088, %s555_s26, %s99_s27  }
  0x26   : > { %p649_p1 = scmp.lt.s32.totalorder %s482_s11, 3  ;;  %p650_p5 = scmp.ge.s32.totalorder %s482_s11, 1 }
  0x28   : > { %p118_p13 = pnand %p650_p5, %p649_p1 }
  0x29   : > { %s123_s15 = sand.u32 (!%p118_p13), 1, %s466_s7  }
  0x2a   : > { %121 = sbr.rel (%p118_p13) target bundleno = 269 (0x10d), region = 24  ;;  %s124_s19 = scalar_lea.sflag (!%p118_p13), [#allocation4], %s123_s15 }
  0x2b   : > { %s341_s18 = smul.u32 (!%p118_p13), 68, %s123_s15 }
  0x2d   : > { %s588_s20 = scalar_lea.vmem (!%p118_p13), [#allocation3], %s341_s18 }
  0x31   : > { %457 = dma.done.wait (%p535_p7), %s124_s19, 1088  }
  0x32   : > { %459 = vsyncadd (%p535_p7), %s124_s19, 4294966208  ;;  %vm154_vm0 = vcmask 3072   ;;  %v485_v0 = vmov 0.0   ;;  %v156_v1 = vld [vmem:[%s588_s20] sm:$0xff]  ;;  %v157_v2 = vld [vmem:[%s588_s20 + $0x8] sm:$0xff]  ;;  %vm199_vm1 = vcmask 1043456  }
  0x33   : > { %155 = vst.msk [vmem:[#allocation2] sm:$0xf] %vm154_vm0, %v485_v0  ;;  %v158_v3 = vld [vmem:[%s588_s20 + $0x10] sm:$0xff]  ;;  %v166_v4 = vmul.f32 %v156_v1, %v156_v1  ;;  %v167_v5 = vmul.f32 %v157_v2, %v157_v2  ;;  %v159_v9 = vld [vmem:[%s588_s20 + $0x18] sm:$0xff]  ;;  %v160_v17 = vld [vmem:[%s588_s20 + $0x20] sm:$0xff]  ;;  %vm231_vm2 = vcmask 60416  }
  0x34   : > { %v168_v7 = vmul.f32 %v158_v3, %v158_v3  ;;  %v169_v14 = vmul.f32 %v159_v9, %v159_v9  ;;  %v170_v21 = vmul.f32 %v160_v17, %v160_v17  ;;  %v161_v24 = vld [vmem:[%s588_s20 + $0x28] sm:$0xff]  ;;  %v162_v31 = vld [vmem:[%s588_s20 + $0x30] sm:$0xff]  ;;  %v163_v38 = vld [vmem:[%s588_s20 + $0x38] sm:$0xff]  ;;  %p146_p7 = scmp.lt.s32.totalorder %s474_s9, 1 }
  0x35   : > { %v183_v6 = vcombine.high %v166_v4, %v166_v4  ;;  %v184_v8 = vcombine.high %v167_v5, %v167_v5  ;;  %v200_v10 = vsel %vm199_vm1, %v166_v4, 0.0  ;;  %v203_v12 = vsel %vm199_vm1, %v167_v5, 0.0  ;;  %v164_v47 = vld [vmem:[%s588_s20 + $0x40] sm:$0xf] }
  0x36   : > { %v185_v15 = vcombine.high %v168_v7, %v168_v7  ;;  %v207_v19 = vsel %vm199_vm1, %v168_v7, 0.0  ;;  %v186_v22 = vcombine.high %v169_v14, %v169_v14  ;;  %v211_v26 = vsel %vm199_vm1, %v169_v14, 0.0  ;;  %s659_s9 = smov (!%p146_p7, %s474_s9), 1 }
  0x37   : > { %v201_v11 = vsel %vm199_vm1, %v183_v6, 0.0  ;;  %v205_v16 = vsel %vm199_vm1, %v184_v8, 0.0  ;;  %v171_v28 = vmul.f32 %v161_v24, %v161_v24  ;;  %v187_v29 = vcombine.high %v170_v21, %v170_v21  ;;  %s336_s16 = sshll.u32 %s659_s9, 2 }
  0x38   : > { %v202_v13 = vadd.f32 %v201_v11, %v200_v10  ;;  %v209_v23 = vsel %vm199_vm1, %v185_v15, 0.0  ;;  %v213_v30 = vsel %vm199_vm1, %v186_v22, 0.0  ;;  %v215_v33 = vsel %vm199_vm1, %v170_v21, 0.0  ;;  %s149_s23 = scalar_lea.vmem %s646_s1, %s336_s16 }
  0x39   : > { %v172_v35 = vmul.f32 %v162_v31, %v162_v31  ;;  %v188_v36 = vcombine.high %v171_v28, %v171_v28  ;;  %v217_v37 = vsel %vm199_vm1, %v187_v29, 0.0  ;;  %v219_v40 = vsel %vm199_vm1, %v171_v28, 0.0 }
  0x3a   : > { %v204_v18 = vadd.f32 %v203_v12, %v202_v13  ;;  %v173_v42 = vmul.f32 %v163_v38, %v163_v38  ;;  %v174_v52 = vmul.f32 %v164_v47, %v164_v47  ;;  %v165_v60 = vld [vmem:[#allocation2] sm:$0xf] }
  0x3b   : > { %v189_v43 = vcombine.high %v172_v35, %v172_v35  ;;  %v221_v44 = vsel %vm199_vm1, %v188_v36, 0.0  ;;  %v223_v46 = vsel %vm199_vm1, %v172_v35, 0.0 }
  0x3c   : > { %v206_v20 = vadd.f32 %v205_v16, %v204_v18  ;;  %v190_v49 = vcombine.high %v173_v42, %v173_v42  ;;  %v227_v53 = vsel %vm199_vm1, %v173_v42, 0.0  ;;  %v232_v57 = vsel %vm231_vm2, %v174_v52, 0.0 }
  0x3d   : > { %v225_v50 = vsel %vm199_vm1, %v189_v43, 0.0 }
  0x3e   : > { %v208_v25 = vadd.f32 %v207_v19, %v206_v20  ;;  %v229_v55 = vsel %vm199_vm1, %v190_v49, 0.0 }
  0x40   : > { %v210_v27 = vadd.f32 %v209_v23, %v208_v25 }
  0x42   : > { %v212_v32 = vadd.f32 %v211_v26, %v210_v27 }
  0x44   : > { %v214_v34 = vadd.f32 %v213_v30, %v212_v32 }
  0x46   : > { %v216_v39 = vadd.f32 %v215_v33, %v214_v34 }
  0x48   : > { %v218_v41 = vadd.f32 %v217_v37, %v216_v39 }
  0x4a   : > { %v220_v45 = vadd.f32 %v219_v40, %v218_v41 }
  0x4c   : > { %v222_v48 = vadd.f32 %v221_v44, %v220_v45 }
  0x4e   : > { %v224_v51 = vadd.f32 %v223_v46, %v222_v48 }
  0x50   : > { %v226_v54 = vadd.f32 %v225_v50, %v224_v51 }
  0x52   : > { %v228_v56 = vadd.f32 %v227_v53, %v226_v54 }
  0x54   : > { %v230_v58 = vadd.f32 %v229_v55, %v228_v56 }
  0x56   : > { %v233_v59 = vadd.f32 %v232_v57, %v230_v58 }
  0x58   : > { %234 = vadd.xlane.f32.xlu0 %v233_v59 }
  0xe5   : > { %v235_v61 = vpop.xlane.xlu0 %234 }
  0xe6   : > { %v236_v62 = vadd.f32 %v235_v61, %v165_v60 }
  0xe8   : > { %238 = vst.msk [vmem:[#allocation2] sm:$0xf] %vm154_vm0, %v236_v62 }
  0xef   : > { %v242_v63 = vld [vmem:[#allocation2] sm:$0xf] }
  0xf0   : > { %398 = vrsqrt.f32 %v242_v63  ;;  %vm245_vm3 = vcmp.eq.f32.partialorder %v242_v63, inf  ;;  %v248_v2 = vand.u32 2147483648, %v242_v63  ;;  %vm247_vm4 = vcmp.eq.f32.partialorder %v242_v63, 0.0 }
  0xfa   : > { %v399_v0 = vpop.eup %398 }
  0xfb   : > { %v244_v1 = vmul.f32 %v399_v0, %v242_v63 }
  0xfd   : > { %v246_v3 = vsel %vm245_vm3, %v242_v63, %v244_v1 }
  0xfe   : > { %v249_v4 = vsel %vm247_vm4, %v248_v2, %v246_v3 }
  0xff   : > { %v250_v5 = vadd.f32 1e-12, %v249_v4 }
 0x101   : > { %400 = vrcp.f32 %v250_v5 }
 0x10b   : > { %v401_v6 = vpop.eup %400 }
 0x10c   : > { %253 = vst.msk [vmem:[%s149_s23] sm:$0xf] %vm154_vm0, %v401_v6 }
 0x10d PF: > { %s14_s11 = sadd.s32 1, %s482_s11   ;;  %s651_s6 = smov %s466_s7 }
 0x10e   : > { %p11_p9 = scmp.ge.s32.totalorder %s14_s11, 4   ;;  %s652_s7 = smov %s470_s8 }
 0x10f   : > { %s653_s8 = smov %s541_s17  ;;  %s654_s9 = smov %s478_s10 }
 0x110   : > { %s655_s10 = smov %s657_s13  ;;  %13 = sbr.rel (!%p11_p9) target bundleno = 4 (0x4), region = 72 }
 0x117   :  { %273 = vsyncpa [#allocation4], 1 }
 0x118   :  { %275 = vsyncpa [#allocation4 + $0x1], 1 }

</bundles_post_ra>
